<compile_context>
chip_gen: v6e
topology: v6e:2x2x1
jax: 0.10.0
libtpu: 0.0.40
codegen_flags: <defaults>
</compile_context>

<pallas_src>
import jax
import jax.numpy as jnp
from jax.experimental import pallas as pl
from jax.experimental.pallas import tpu as pltpu

# Module hyperparameters (vec_len / label_len are undefined globals in the
# reference; pick small deterministic values consistent with an MLP).
VEC_LEN = 4
UNIFORM_SIZE = 300
IN_DIM = VEC_LEN * UNIFORM_SIZE   # 1200
H_SIZE = 128
LABEL_LEN = 10

SUBLANE = 8


def _round_up(x, m):
    return ((x + m - 1) // m) * m


def mlp_kernel(x_ref, w1_ref, b1_ref, w2_ref, b2_ref, o_ref):
    # hidden = ReLU(x @ W1 + b1); accumulate in f32 on the MXU.
    h = jnp.dot(x_ref[...], w1_ref[...], preferred_element_type=jnp.float32)
    h = jnp.maximum(h + b1_ref[...], 0.0)
    # out = h @ W2 + b2; feed GEMM2 in the weight dtype (no-op for f32, keeps
    # a bf16-weight path at the fast MXU rate), accumulate in f32.
    o = jnp.dot(h.astype(w2_ref.dtype), w2_ref[...],
                preferred_element_type=jnp.float32)
    o_ref[...] = (o + b2_ref[...]).astype(o_ref.dtype)


def mlp_forward(x, w1, b1, w2, b2, *, block_b=1024):
    """x: [B, IN_DIM]; w1: [IN_DIM, H]; b1: [1, H]; w2: [H, N]; b2: [1, N].

    Returns [B, N] in x.dtype.  block_b is the batch tile size: 1024 keeps the
    double-buffered f32 x tile (~10 MiB) inside every generation's default
    scoped VMEM (16/32/32 MiB on v5e/v6e/v7x).  On v6e/v7x block_b=2048 (with
    vmem_limit_bytes raised) shaves a few more % of per-step overhead.  For
    the bf16 HBM-traffic win, pass x (and weights) already stored in bf16;
    accumulation and the bias epilogue stay f32 inside the kernel.
    """
    out_dtype = x.dtype
    B, in_dim = x.shape
    H = w1.shape[1]
    N = w2.shape[1]

    # --- Batch tile selection (no batch padding: ragged last tile is handled
    # by Pallas with masked output writes; garbage padded rows stay row-local
    # in this kernel so they cannot leak into kept rows). ---
    if B <= SUBLANE:
        tb = B                      # single block equal to the full batch dim
    else:
        tb = min(block_b, B)
        # Ensure at least 2 grid steps so v7x's two TensorCores both get work
        # through the "parallel" axis (neutral on single-TC v5e/v6e).
        if pl.cdiv(B, tb) < 2:
            tb = _round_up(pl.cdiv(B, 2), SUBLANE)
        tb = max(SUBLANE, (tb // SUBLANE) * SUBLANE)
    grid_b = pl.cdiv(B, tb)

    cost = pl.CostEstimate(
        flops=2 * B * in_dim * H + 2 * B * H * N,
        transcendentals=0,
        bytes_accessed=(B * in_dim * jnp.dtype(x.dtype).itemsize        # x
                        + in_dim * H * jnp.dtype(w1.dtype).itemsize     # w1
                        + H * N * jnp.dtype(w2.dtype).itemsize          # w2
                        + b1.size * jnp.dtype(b1.dtype).itemsize        # b1
                        + b2.size * jnp.dtype(b2.dtype).itemsize        # b2
                        + B * N * jnp.dtype(out_dtype).itemsize))       # out

    out = pl.pallas_call(
        mlp_kernel,
        out_shape=jax.ShapeDtypeStruct((B, N), out_dtype),
        grid_spec=pltpu.PrefetchScalarGridSpec(
            num_scalar_prefetch=0,
            grid=(grid_b,),
            in_specs=[
                # x: batch-tiled, full (unpadded) K=1200 as the last dim.
                pl.BlockSpec((tb, in_dim), lambda i: (i, 0)),
                # Grid-invariant blocks (constant index_map): fetched once,
                # stay VMEM-resident, no per-tile re-DMA.
                pl.BlockSpec((in_dim, H), lambda i: (0, 0)),
                pl.BlockSpec((1, H), lambda i: (0, 0)),
                pl.BlockSpec((H, N), lambda i: (0, 0)),
                pl.BlockSpec((1, N), lambda i: (0, 0)),
            ],
            # Output written at its native width N=10 (full-dim last axis);
            # the masked vst is negligible next to the x DMA per tile.
            out_specs=pl.BlockSpec((tb, N), lambda i: (i, 0)),
        ),
        compiler_params=pltpu.CompilerParams(
            # Batch tiles are independent: lets v7x shard them across its two
            # TensorCores; neutral on single-TC v5e/v6e.
            dimension_semantics=("parallel",)),
        cost_estimate=cost,
    )(x, w1, b1, w2, b2)

    return out


def init_params(key):
    """Deterministic init mimicking nn.Linear's U(-1/sqrt(fan_in), 1/sqrt(fan_in))."""
    k1, k2, k3, k4 = jax.random.split(key, 4)
    bound1 = 1.0 / jnp.sqrt(IN_DIM)
    bound2 = 1.0 / jnp.sqrt(H_SIZE)
    # Stored already transposed to [in, out] for the kernel.
    w1 = jax.random.uniform(k1, (IN_DIM, H_SIZE), jnp.float32, -bound1, bound1)
    b1 = jax.random.uniform(k2, (1, H_SIZE), jnp.float32, -bound1, bound1)
    w2 = jax.random.uniform(k3, (H_SIZE, LABEL_LEN), jnp.float32, -bound2, bound2)
    b2 = jax.random.uniform(k4, (1, LABEL_LEN), jnp.float32, -bound2, bound2)
    return w1, b1, w2, b2


def mlp_reference(x, w1, b1, w2, b2):
    h = jnp.maximum(x @ w1 + b1, 0.0)
    return h @ w2 + b2


if __name__ == "__main__":
    key = jax.random.PRNGKey(0)
    kx, kp = jax.random.split(key)
    w1, b1, w2, b2 = init_params(kp)

    # Small batch, single full-batch block (B == tb, full-dim block shape).
    B = 2
    x = jax.random.normal(kx, (B, IN_DIM), jnp.float32)
    ref = mlp_reference(x, w1, b1, w2, b2)
    out = jax.block_until_ready(mlp_forward(x, w1, b1, w2, b2))
    assert out.shape == (B, LABEL_LEN), out.shape
    assert jnp.allclose(out, ref, atol=1e-4, rtol=1e-4), "f32 mismatch vs reference"

    # Ragged batch (B not a multiple of tb): exercises the pl.cdiv grid with
    # masked output writes on the last partial tile.
    B2 = 13
    x2 = jax.random.normal(jax.random.PRNGKey(1), (B2, IN_DIM), jnp.float32)
    out2 = jax.block_until_ready(mlp_forward(x2, w1, b1, w2, b2, block_b=8))
    ref2 = mlp_reference(x2, w1, b1, w2, b2)
    assert out2.shape == (B2, LABEL_LEN), out2.shape
    assert jnp.all(jnp.isfinite(out2)), "non-finite values leaked from padded rows"
    assert jnp.allclose(out2, ref2, atol=1e-4, rtol=1e-4), "ragged-tile mismatch vs reference"

    # Exact multi-tile divide (pipelined batch tiles).
    B3 = 24
    x3 = jax.random.normal(jax.random.PRNGKey(2), (B3, IN_DIM), jnp.float32)
    out3 = jax.block_until_ready(mlp_forward(x3, w1, b1, w2, b2, block_b=8))
    ref3 = mlp_reference(x3, w1, b1, w2, b2)
    assert out3.shape == (B3, LABEL_LEN), out3.shape
    assert jnp.allclose(out3, ref3, atol=1e-4, rtol=1e-4), "tiled mismatch vs reference"

    # bf16 supplied upstream (no wrapper cast): kernel keeps f32 MXU
    # accumulation; loose tolerance for bf16 storage precision.
    out_bf = jax.block_until_ready(
        mlp_forward(x.astype(jnp.bfloat16),
                    w1.astype(jnp.bfloat16), b1,
                    w2.astype(jnp.bfloat16), b2))
    assert out_bf.shape == (B, LABEL_LEN), out_bf.shape
    assert jnp.allclose(out_bf.astype(jnp.float32), ref, atol=5e-2, rtol=5e-2), \
        "bf16 mismatch vs reference"

    print("KERNEL_OK")
</pallas_src>

<mosaic_0001>
module attributes {stable_mosaic.version = 11 : i64} {
  func.func @mlp_kernel(%arg0: i32, %arg1: memref<2x1200xf32, #tpu.memory_space<vmem>>, %arg2: memref<1200x128xf32, #tpu.memory_space<vmem>>, %arg3: memref<1x128xf32, #tpu.memory_space<vmem>>, %arg4: memref<128x10xf32, #tpu.memory_space<vmem>>, %arg5: memref<1x10xf32, #tpu.memory_space<vmem>>, %arg6: memref<2x10xf32, #tpu.memory_space<vmem>>) attributes {dimension_semantics = [#tpu.dimension_semantics<parallel>], iteration_bounds = array<i64: 1>, scalar_prefetch = 0 : i64, scratch_operands = 0 : i64, tpu.core_type = #tpu.core_type<tc>, window_params = [{transform_indices = @transform_0, window_bounds = array<i64: 2, 1200>}, {pipeline_mode = #tpu.pipeline_mode<synchronous>, transform_indices = @transform_1, window_bounds = array<i64: 1200, 128>}, {pipeline_mode = #tpu.pipeline_mode<synchronous>, transform_indices = @transform_2, window_bounds = array<i64: 1, 128>}, {pipeline_mode = #tpu.pipeline_mode<synchronous>, transform_indices = @transform_3, window_bounds = array<i64: 128, 10>}, {pipeline_mode = #tpu.pipeline_mode<synchronous>, transform_indices = @transform_4, window_bounds = array<i64: 1, 10>}, {transform_indices = @transform_5, window_bounds = array<i64: 2, 10>}]} {
    %c0 = arith.constant 0 : index
    %c0_0 = arith.constant 0 : index
    %0 = vector.load %arg1[%c0, %c0_0] : memref<2x1200xf32, #tpu.memory_space<vmem>>, vector<2x1200xf32>
    %c0_1 = arith.constant 0 : index
    %c0_2 = arith.constant 0 : index
    %1 = vector.load %arg2[%c0_1, %c0_2] : memref<1200x128xf32, #tpu.memory_space<vmem>>, vector<1200x128xf32>
    %cst = arith.constant dense<0.000000e+00> : vector<2x128xf32>
    %2 = tpu.matmul %0, %1, %cst {dimension_numbers = #tpu.dot_dimension_numbers<[1], [0], [0], [1], [0, 0, 1, 1], [], []>} : vector<2x1200xf32>, vector<1200x128xf32>, vector<2x128xf32> -> vector<2x128xf32>
    %c0_3 = arith.constant 0 : index
    %c0_4 = arith.constant 0 : index
    %3 = vector.load %arg3[%c0_3, %c0_4] : memref<1x128xf32, #tpu.memory_space<vmem>>, vector<1x128xf32>
    %4 = vector.broadcast %3 : vector<1x128xf32> to vector<2x128xf32>
    %5 = arith.addf %2, %4 : vector<2x128xf32>
    %cst_5 = arith.constant 0.000000e+00 : f32
    %6 = vector.broadcast %cst_5 : f32 to vector<2x128xf32>
    %7 = arith.maximumf %5, %6 : vector<2x128xf32>
    %c0_6 = arith.constant 0 : index
    %c0_7 = arith.constant 0 : index
    %8 = vector.load %arg4[%c0_6, %c0_7] : memref<128x10xf32, #tpu.memory_space<vmem>>, vector<128x10xf32>
    %cst_8 = arith.constant dense<0.000000e+00> : vector<2x10xf32>
    %9 = tpu.matmul %7, %8, %cst_8 {dimension_numbers = #tpu.dot_dimension_numbers<[1], [0], [0], [1], [0, 0, 1, 1], [], []>} : vector<2x128xf32>, vector<128x10xf32>, vector<2x10xf32> -> vector<2x10xf32>
    %c0_9 = arith.constant 0 : index
    %c0_10 = arith.constant 0 : index
    %10 = vector.load %arg5[%c0_9, %c0_10] : memref<1x10xf32, #tpu.memory_space<vmem>>, vector<1x10xf32>
    %11 = vector.broadcast %10 : vector<1x10xf32> to vector<2x10xf32>
    %12 = arith.addf %9, %11 : vector<2x10xf32>
    %c0_11 = arith.constant 0 : index
    %c0_12 = arith.constant 0 : index
    %13 = vector.load %arg6[%c0_11, %c0_12] : memref<2x10xf32, #tpu.memory_space<vmem>>, vector<2x10xf32>
    tpu.vector_store %arg6[%c0_11, %c0_12], %12 {strides = array<i32>} : memref<2x10xf32, #tpu.memory_space<vmem>>, vector<2x10xf32>,
    return
  }
  func.func @transform_0(%arg0: i32) -> (i32, i32) {
    %c0_i32 = arith.constant 0 : i32
    %c0_i32_0 = arith.constant 0 : i32
    return %arg0, %c0_i32 : i32, i32
  }
  func.func @transform_1(%arg0: i32) -> (i32, i32) {
    %c0_i32 = arith.constant 0 : i32
    %c0_i32_0 = arith.constant 0 : i32
    %c0_i32_1 = arith.constant 0 : i32
    return %c0_i32, %c0_i32_0 : i32, i32
  }
  func.func @transform_2(%arg0: i32) -> (i32, i32) {
    %c0_i32 = arith.constant 0 : i32
    %c0_i32_0 = arith.constant 0 : i32
    %c0_i32_1 = arith.constant 0 : i32
    return %c0_i32, %c0_i32_0 : i32, i32
  }
  func.func @transform_3(%arg0: i32) -> (i32, i32) {
    %c0_i32 = arith.constant 0 : i32
    %c0_i32_0 = arith.constant 0 : i32
    %c0_i32_1 = arith.constant 0 : i32
    return %c0_i32, %c0_i32_0 : i32, i32
  }
  func.func @transform_4(%arg0: i32) -> (i32, i32) {
    %c0_i32 = arith.constant 0 : i32
    %c0_i32_0 = arith.constant 0 : i32
    %c0_i32_1 = arith.constant 0 : i32
    return %c0_i32, %c0_i32_0 : i32, i32
  }
  func.func @transform_5(%arg0: i32) -> (i32, i32) {
    %c0_i32 = arith.constant 0 : i32
    %c0_i32_0 = arith.constant 0 : i32
    return %arg0, %c0_i32 : i32, i32
  }
}

</mosaic_0001>

<bundles_post_ra>
// kernel: tpu_custom_call.1
= control target key start
LH: loop header
LB: loop body
LE: loop exit
PB: predicated region body
PF: predicated region fallthrough
CT: control target
= control target key end

     0   :  { %10 = vsyncpa [#allocation3], 0  ;;  %s1118_s0 = inlined_call_operand.vmem [shape: f32[2,1200], index: 0, kind: input, shape index: {}]   ;;  %s1119_s1 = inlined_call_operand.hbm [shape: f32[1200,128], index: 1, kind: input, shape index: {}]   ;;  %s1120_s2 = inlined_call_operand.vmem [shape: f32[1,128], index: 2, kind: input, shape index: {}]   ;;  %s1121_s3 = inlined_call_operand.vmem [shape: f32[128,10], index: 3, kind: input, shape index: {}]   ;;  %s1122_s4 = inlined_call_operand.vmem [shape: f32[1,10], index: 4, kind: input, shape index: {}]   ;;  %s1123_s5 = inlined_call_operand.hbm [shape: f32[2,10], index: 5, kind: output, shape index: {}]  }
   0x1   :  { %11 = vsyncpa [#allocation4], 0  ;;  %s962_s18 = smov [#allocation2]  }
   0x2   :  { %s19_s19 = sshll.u32 %s962_s18, 4  ;;  %s20_s19 = int_to_ptr.vmem [resolvable:$true] %s19_s19 }
   0x3   :  { %s926_s20 = scalar_lea.vmem %s20_s19, 19200  ;;  %p931_p1 = scmp.lt.s32.totalorder %s20_s19, %s20_s19 }
   0x4   :  { %p927_p0 = scmp.ne.s32.totalorder %s20_s19, %s926_s20  ;;  %p932_p2 = scmp.lt.s32.totalorder %s926_s20, %s926_s20 }
   0x6   :  { %p933_p3 = por %p932_p2, %p931_p1 }
   0x8   :  { %p934_p4 = pnand %p933_p3, %p927_p0 }
   0xa   :  { %937 = shalt.err (!%p934_p4)
}
   0xb   :  { %s963_s21 = smov 128   ;;  %s964_s22 = smov 8  }
   0xc   :  { %25 = dma.hbm_to_vmem [thread:$0]  %s1119_s1, 19200, %s20_s19, [#allocation3], %s963_s21, %s963_s21, %s964_s22  }
   0xd   :  { %958 = dma.done.wait [#allocation3], 19200  }
   0xe   :  { %959 = vsyncadd [#allocation3], 4294948096  ;;  %v69_v0 = vld [vmem:[#allocation2 + $0xf8] sm:$0xff]  ;;  %v68_v2 = vld [vmem:[#allocation2 + $0xf0] sm:$0xff]  ;;  %v965_v27 = vmov 1983009808   ;;  %v202_v29 = vlaneseq }
   0xf   :  { %v53_v1 = vld [vmem:[#allocation2 + $0x78] sm:$0xff]  ;;  %717 = vmatprep.subr.mxu0 %v69_v0  ;;  %v52_v4 = vld [vmem:[#allocation2 + $0x70] sm:$0xff]  ;;  %v67_v6 = vld [vmem:[#allocation2 + $0xe8] sm:$0xff]  ;;  %v200_v28 = vunpack.c.l.s4 %v965_v27  ;;  %vm249_vm0 = vcmask 392192   ;;  %vm967_vm1 = vmmov 0   ;;  %vm696_vm2 = vcmask 74752  }
  0x10   :  { %v101_v3 = vld [vmem:[#allocation2 + $0x1f8] sm:$0xff]  ;;  %718 = vmatpush3.msra.mxu0 %v53_v1  ;;  %v100_v7 = vld [vmem:[#allocation2 + $0x1f0] sm:$0xff]  ;;  %v51_v8 = vld [vmem:[#allocation2 + $0x68] sm:$0xff]  ;;  %v203_v39 = vshrl.u32 %v202_v29, 7 }
  0x11   :  { %v85_v5 = vld [vmem:[#allocation2 + $0x178] sm:$0xff]  ;;  %752 = vmatprep.subr.mxu1 %v101_v3  ;;  %719 = vmatprep.subr.mxu0 %v68_v2  ;;  %v84_v9 = vld [vmem:[#allocation2 + $0x170] sm:$0xff]  ;;  %v99_v10 = vld [vmem:[#allocation2 + $0x1e8] sm:$0xff]  ;;  %v201_v38 = vunpack.c.0.s8 %v200_v28 }
  0x12   :  { %753 = vmatpush3.msra.mxu1 %v85_v5  ;;  %720 = vmatpush3.msra.mxu0 %v52_v4  ;;  %v66_v11 = vld [vmem:[#allocation2 + $0xe0] sm:$0xff]  ;;  %v83_v12 = vld [vmem:[#allocation2 + $0x168] sm:$0xff]  ;;  %v65_v15 = vld [vmem:[#allocation2 + $0xd8] sm:$0xff] }
  0x13   :  { %754 = vmatprep.subr.mxu1 %v100_v7  ;;  %721 = vmatprep.subr.mxu0 %v67_v6  ;;  %v50_v13 = vld [vmem:[#allocation2 + $0x60] sm:$0xff]  ;;  %v49_v17 = vld [vmem:[#allocation2 + $0x58] sm:$0xff]  ;;  %v64_v19 = vld [vmem:[#allocation2 + $0xd0] sm:$0xff]  ;;  %v1002_v48 = vsub.s32 %v201_v38, %v203_v39 }
  0x14   :  { %755 = vmatpush3.msra.mxu1 %v84_v9  ;;  %v98_v14 = vld [vmem:[#allocation2 + $0x1e0] sm:$0xff]  ;;  %722 = vmatpush3.msra.mxu0 %v51_v8  ;;  %v97_v18 = vld [vmem:[#allocation2 + $0x1d8] sm:$0xff]  ;;  %v48_v21 = vld [vmem:[#allocation2 + $0x50] sm:$0xff] }
  0x15   :  { %756 = vmatprep.subr.mxu1 %v99_v10  ;;  %v82_v16 = vld [vmem:[#allocation2 + $0x160] sm:$0xff]  ;;  %723 = vmatprep.subr.mxu0 %v66_v11  ;;  %v81_v20 = vld [vmem:[#allocation2 + $0x158] sm:$0xff]  ;;  %v96_v22 = vld [vmem:[#allocation2 + $0x1d0] sm:$0xff] }
  0x16   :  { %757 = vmatpush3.msra.mxu1 %v83_v12  ;;  %724 = vmatpush3.msra.mxu0 %v50_v13  ;;  %v63_v23 = vld [vmem:[#allocation2 + $0xc8] sm:$0xff]  ;;  %v80_v24 = vld [vmem:[#allocation2 + $0x150] sm:$0xff]  ;;  %v62_v30 = vld [vmem:[#allocation2 + $0xc0] sm:$0xff] }
  0x17   :  { %758 = vmatprep.subr.mxu1 %v98_v14  ;;  %725 = vmatprep.subr.mxu0 %v65_v15  ;;  %v47_v25 = vld [vmem:[#allocation2 + $0x48] sm:$0xff]  ;;  %v46_v32 = vld [vmem:[#allocation2 + $0x40] sm:$0xff]  ;;  %v61_v34 = vld [vmem:[#allocation2 + $0xb8] sm:$0xff] }
  0x18   :  { %759 = vmatpush3.msra.mxu1 %v82_v16  ;;  %726 = vmatpush3.msra.mxu0 %v49_v17  ;;  %v95_v26 = vld [vmem:[#allocation2 + $0x1c8] sm:$0xff]  ;;  %v94_v33 = vld [vmem:[#allocation2 + $0x1c0] sm:$0xff]  ;;  %v45_v36 = vld [vmem:[#allocation2 + $0x38] sm:$0xff] }
  0x19   :  { %760 = vmatprep.subr.mxu1 %v97_v18  ;;  %727 = vmatprep.subr.mxu0 %v64_v19  ;;  %v79_v31 = vld [vmem:[#allocation2 + $0x148] sm:$0xff]  ;;  %v78_v35 = vld [vmem:[#allocation2 + $0x140] sm:$0xff]  ;;  %v93_v37 = vld [vmem:[#allocation2 + $0x1b8] sm:$0xff] }
  0x1a   :  { %761 = vmatpush3.msra.mxu1 %v81_v20  ;;  %728 = vmatpush3.msra.mxu0 %v48_v21  ;;  %v60_v40 = vld [vmem:[#allocation2 + $0xb0] sm:$0xff]  ;;  %v77_v41 = vld [vmem:[#allocation2 + $0x138] sm:$0xff]  ;;  %v59_v44 = vld [vmem:[#allocation2 + $0xa8] sm:$0xff] }
  0x1b   :  { %762 = vmatprep.subr.mxu1 %v96_v22  ;;  %729 = vmatprep.subr.mxu0 %v63_v23  ;;  %v44_v42 = vld [vmem:[#allocation2 + $0x30] sm:$0xff]  ;;  %v43_v46 = vld [vmem:[#allocation2 + $0x28] sm:$0xff]  ;;  %v58_v49 = vld [vmem:[#allocation2 + $0xa0] sm:$0xff] }
  0x1c   :  { %763 = vmatpush3.msra.mxu1 %v80_v24  ;;  %730 = vmatpush3.msra.mxu0 %v47_v25  ;;  %v92_v43 = vld [vmem:[#allocation2 + $0x1b0] sm:$0xff]  ;;  %v91_v47 = vld [vmem:[#allocation2 + $0x1a8] sm:$0xff]  ;;  %v35_v51 = vld [vmem:[%s1118_s0] sm:$0xff] }
  0x1d   :  { %764 = vmatprep.subr.mxu1 %v95_v26  ;;  %731 = vmatprep.subr.mxu0 %v62_v30  ;;  %v76_v45 = vld [vmem:[#allocation2 + $0x130] sm:$0xff]  ;;  %v75_v50 = vld [vmem:[#allocation2 + $0x128] sm:$0xff]  ;;  %v42_v52 = vld [vmem:[#allocation2 + $0x20] sm:$0xff]  ;;  %v205_v58 = vrot.slane %v35_v51, %v1002_v48  ;;  %v198_v59 = vcombine.high %v35_v51, %v35_v51 }
  0x1e   :  { %765 = vmatpush3.msra.mxu1 %v79_v31  ;;  %732 = vmatpush3.msra.mxu0 %v46_v32  ;;  %v90_v53 = vld [vmem:[#allocation2 + $0x1a0] sm:$0xff]  ;;  %v57_v54 = vld [vmem:[#allocation2 + $0x98] sm:$0xff]  ;;  %v56_v60 = vld [vmem:[#allocation2 + $0x90] sm:$0xff] }
  0x1f   :  { %766 = vmatprep.subr.mxu1 %v94_v33  ;;  %733 = vmatprep.subr.mxu0 %v61_v34  ;;  %v74_v55 = vld [vmem:[#allocation2 + $0x120] sm:$0xff]  ;;  %v41_v56 = vld [vmem:[#allocation2 + $0x18] sm:$0xff]  ;;  %v40_v62 = vld [vmem:[#allocation2 + $0x10] sm:$0xff]  ;;  %v213_v4 = vcombine.high %v205_v58, %v205_v58  ;;  %v212_v5 = vrot.slane %v198_v59, %v1002_v48 }
  0x20   :  { %767 = vmatpush3.msra.mxu1 %v78_v35  ;;  %734 = vmatpush3.msra.mxu0 %v45_v36  ;;  %v89_v57 = vld [vmem:[#allocation2 + $0x198] sm:$0xff]  ;;  %v88_v63 = vld [vmem:[#allocation2 + $0x190] sm:$0xff]  ;;  %v55_v0 = vld [vmem:[#allocation2 + $0x88] sm:$0xff] }
  0x21   :  { %768 = vmatprep.subr.mxu1 %v93_v37  ;;  %735 = vmatprep.subr.mxu0 %v60_v40  ;;  %v73_v61 = vld [vmem:[#allocation2 + $0x118] sm:$0xff]  ;;  %v72_v1 = vld [vmem:[#allocation2 + $0x110] sm:$0xff]  ;;  %v39_v2 = vld [vmem:[#allocation2 + $0x8] sm:$0xff]  ;;  %v214_v12 = vcombine.high %v212_v5, %v212_v5 }
  0x22   :  { %769 = vmatpush3.msra.mxu1 %v77_v41  ;;  %736 = vmatpush3.msra.mxu0 %v44_v42  ;;  %v87_v3 = vld [vmem:[#allocation2 + $0x188] sm:$0xff]  ;;  %v54_v6 = vld [vmem:[#allocation2 + $0x80] sm:$0xff]  ;;  %v133_v10 = vld [vmem:[#allocation2 + $0x2f8] sm:$0xff] }
  0x23   :  { %770 = vmatprep.subr.mxu1 %v92_v43  ;;  %737 = vmatprep.subr.mxu0 %v59_v44  ;;  %v38_v7 = vld [vmem:[#allocation2] sm:$0xff]  ;;  %v71_v8 = vld [vmem:[#allocation2 + $0x108] sm:$0xff]  ;;  %v117_v13 = vld [vmem:[#allocation2 + $0x278] sm:$0xff] }
  0x24   :  { %771 = vmatpush3.msra.mxu1 %v76_v45  ;;  %738 = vmatpush3.msra.mxu0 %v43_v46  ;;  %v86_v9 = vld [vmem:[#allocation2 + $0x180] sm:$0xff]  ;;  %v132_v14 = vld [vmem:[#allocation2 + $0x2f0] sm:$0xff]  ;;  %v165_v15 = vld [vmem:[#allocation2 + $0x3f8] sm:$0xff] }
  0x25   :  { %772 = vmatprep.subr.mxu1 %v91_v47  ;;  %739 = vmatprep.subr.mxu0 %v58_v49  ;;  %v70_v11 = vld [vmem:[#allocation2 + $0x100] sm:$0xff]  ;;  %v116_v16 = vld [vmem:[#allocation2 + $0x270] sm:$0xff]  ;;  %v149_v17 = vld [vmem:[#allocation2 + $0x378] sm:$0xff] }
  0x26   :  { %773 = vmatpush3.msra.mxu1 %v75_v50  ;;  %740 = vmatpush3.msra.mxu0 %v42_v52  ;;  %v131_v18 = vld [vmem:[#allocation2 + $0x2e8] sm:$0xff]  ;;  %v164_v19 = vld [vmem:[#allocation2 + $0x3f0] sm:$0xff]  ;;  %v130_v22 = vld [vmem:[#allocation2 + $0x2e0] sm:$0xff] }
  0x27   :  { %774 = vmatprep.subr.mxu1 %v90_v53  ;;  %741 = vmatprep.subr.mxu0 %v57_v54  ;;  %v115_v20 = vld [vmem:[#allocation2 + $0x268] sm:$0xff]  ;;  %v148_v21 = vld [vmem:[#allocation2 + $0x370] sm:$0xff]  ;;  %v114_v24 = vld [vmem:[#allocation2 + $0x260] sm:$0xff] }
  0x28   :  { %775 = vmatpush3.msra.mxu1 %v74_v55  ;;  %742 = vmatpush3.msra.mxu0 %v41_v56  ;;  %v163_v23 = vld [vmem:[#allocation2 + $0x3e8] sm:$0xff]  ;;  %v129_v26 = vld [vmem:[#allocation2 + $0x2d8] sm:$0xff]  ;;  %v162_v27 = vld [vmem:[#allocation2 + $0x3e0] sm:$0xff] }
  0x29   :  { %776 = vmatprep.subr.mxu1 %v89_v57  ;;  %743 = vmatprep.subr.mxu0 %v56_v60  ;;  %v147_v25 = vld [vmem:[#allocation2 + $0x368] sm:$0xff]  ;;  %v113_v28 = vld [vmem:[#allocation2 + $0x258] sm:$0xff]  ;;  %v146_v29 = vld [vmem:[#allocation2 + $0x360] sm:$0xff] }
  0x2a   :  { %777 = vmatpush3.msra.mxu1 %v73_v61  ;;  %744 = vmatpush3.msra.mxu0 %v40_v62  ;;  %v128_v30 = vld [vmem:[#allocation2 + $0x2d0] sm:$0xff]  ;;  %v161_v31 = vld [vmem:[#allocation2 + $0x3d8] sm:$0xff]  ;;  %v127_v34 = vld [vmem:[#allocation2 + $0x2c8] sm:$0xff] }
  0x2b   :  { %778 = vmatprep.subr.mxu1 %v88_v63  ;;  %745 = vmatprep.subr.mxu0 %v55_v0  ;;  %v112_v32 = vld [vmem:[#allocation2 + $0x250] sm:$0xff]  ;;  %v145_v33 = vld [vmem:[#allocation2 + $0x358] sm:$0xff]  ;;  %v111_v36 = vld [vmem:[#allocation2 + $0x248] sm:$0xff] }
  0x2c   :  { %779 = vmatpush3.msra.mxu1 %v72_v1  ;;  %746 = vmatpush3.msra.mxu0 %v39_v2  ;;  %v160_v35 = vld [vmem:[#allocation2 + $0x3d0] sm:$0xff]  ;;  %v126_v38 = vld [vmem:[#allocation2 + $0x2c0] sm:$0xff]  ;;  %v159_v39 = vld [vmem:[#allocation2 + $0x3c8] sm:$0xff] }
  0x2d   :  { %780 = vmatprep.subr.mxu1 %v87_v3  ;;  %747 = vmatprep.subr.mxu0 %v54_v6  ;;  %v144_v37 = vld [vmem:[#allocation2 + $0x350] sm:$0xff]  ;;  %v110_v40 = vld [vmem:[#allocation2 + $0x240] sm:$0xff]  ;;  %v143_v41 = vld [vmem:[#allocation2 + $0x348] sm:$0xff] }
  0x2e   :  { %316 = vmatprep.mubr.f32.mxu0 %v213_v4  ;;  %748 = vmatpush3.msra.mxu0 %v38_v7  ;;  %v125_v42 = vld [vmem:[#allocation2 + $0x2b8] sm:$0xff]  ;;  %v158_v43 = vld [vmem:[#allocation2 + $0x3c0] sm:$0xff]  ;;  %v124_v46 = vld [vmem:[#allocation2 + $0x2b0] sm:$0xff] }
  0x2f   :  { %781 = vmatpush3.msra.mxu1 %v71_v8  ;;  %317 = vmatmul.mubr.f32.vlgmr.msra.gmra.mxu0 %v205_v58  ;;  %v109_v44 = vld [vmem:[#allocation2 + $0x238] sm:$0xff]  ;;  %v142_v45 = vld [vmem:[#allocation2 + $0x340] sm:$0xff]  ;;  %v108_v49 = vld [vmem:[#allocation2 + $0x230] sm:$0xff] }
  0x30   :  { %782 = vmatprep.subr.mxu1 %v86_v9  ;;  %787 = vmatprep.subr.mxu0 %v133_v10  ;;  %v157_v47 = vld [vmem:[#allocation2 + $0x3b8] sm:$0xff]  ;;  %v123_v51 = vld [vmem:[#allocation2 + $0x2a8] sm:$0xff]  ;;  %v156_v52 = vld [vmem:[#allocation2 + $0x3b0] sm:$0xff] }
  0x31   :  { %783 = vmatpush3.msra.mxu1 %v70_v11  ;;  %386 = vmatprep.mubr.f32.mxu1 %v214_v12  ;;  %v141_v50 = vld [vmem:[#allocation2 + $0x338] sm:$0xff]  ;;  %v107_v53 = vld [vmem:[#allocation2 + $0x228] sm:$0xff]  ;;  %v140_v54 = vld [vmem:[#allocation2 + $0x330] sm:$0xff] }
  0x32   :  { %788 = vmatpush3.msra.mxu0 %v117_v13  ;;  %387 = vmatmul.mubr.f32.vlgmr.msra.gmra.mxu1 %v212_v5  ;;  %v122_v55 = vld [vmem:[#allocation2 + $0x2a0] sm:$0xff]  ;;  %v155_v56 = vld [vmem:[#allocation2 + $0x3a8] sm:$0xff]  ;;  %v121_v60 = vld [vmem:[#allocation2 + $0x298] sm:$0xff] }
  0x33   :  { %789 = vmatprep.subr.mxu0 %v132_v14  ;;  %822 = vmatprep.subr.mxu1 %v165_v15  ;;  %v106_v57 = vld [vmem:[#allocation2 + $0x220] sm:$0xff]  ;;  %v36_v58 = vld [vmem:[%s1118_s0 + $0x8] sm:$0xff]  ;;  %v105_v62 = vld [vmem:[#allocation2 + $0x218] sm:$0xff] }
  0x34   :  { %790 = vmatpush3.msra.mxu0 %v116_v16  ;;  %823 = vmatpush3.msra.mxu1 %v149_v17  ;;  %v139_v59 = vld [vmem:[#allocation2 + $0x328] sm:$0xff]  ;;  %v154_v61 = vld [vmem:[#allocation2 + $0x3a0] sm:$0xff]  ;;  %v120_v0 = vld [vmem:[#allocation2 + $0x290] sm:$0xff]  ;;  %v215_v1 = vcombine.high %v36_v58, %v36_v58  ;;  %v222_v4 = vrot.slane %v36_v58, %v1002_v48 }
  0x35   :  { %791 = vmatprep.subr.mxu0 %v131_v18  ;;  %824 = vmatprep.subr.mxu1 %v164_v19  ;;  %v138_v63 = vld [vmem:[#allocation2 + $0x320] sm:$0xff]  ;;  %v153_v2 = vld [vmem:[#allocation2 + $0x398] sm:$0xff]  ;;  %v104_v3 = vld [vmem:[#allocation2 + $0x210] sm:$0xff] }
  0x36   :  { %792 = vmatpush3.msra.mxu0 %v115_v20  ;;  %825 = vmatpush3.msra.mxu1 %v148_v21  ;;  %v137_v5 = vld [vmem:[#allocation2 + $0x318] sm:$0xff]  ;;  %v119_v6 = vld [vmem:[#allocation2 + $0x288] sm:$0xff]  ;;  %v152_v7 = vld [vmem:[#allocation2 + $0x390] sm:$0xff]  ;;  %v229_v11 = vrot.slane %v215_v1, %v1002_v48  ;;  %v230_v14 = vcombine.high %v222_v4, %v222_v4  ;;  %v966_v21 = vmov 0.0  }
  0x37   :  { %793 = vmatprep.subr.mxu0 %v130_v22  ;;  %826 = vmatprep.subr.mxu1 %v163_v23  ;;  %v103_v8 = vld [vmem:[#allocation2 + $0x208] sm:$0xff]  ;;  %v136_v9 = vld [vmem:[#allocation2 + $0x310] sm:$0xff]  ;;  %v118_v10 = vld [vmem:[#allocation2 + $0x280] sm:$0xff] }
  0x38   :  { %794 = vmatpush3.msra.mxu0 %v114_v24  ;;  %827 = vmatpush3.msra.mxu1 %v147_v25  ;;  %v151_v12 = vld [vmem:[#allocation2 + $0x388] sm:$0xff]  ;;  %v102_v13 = vld [vmem:[#allocation2 + $0x200] sm:$0xff]  ;;  %v1017_v17 = vld.sshfl [vmem:[%s1118_s0 + $0x10] sm:$0x33 pattern:$0x76325410]  ;;  %v231_v48 = vcombine.high %v229_v11, %v229_v11 }
  0x39   :  { %795 = vmatprep.subr.mxu0 %v129_v26  ;;  %828 = vmatprep.subr.mxu1 %v162_v27  ;;  %v135_v15 = vld [vmem:[#allocation2 + $0x308] sm:$0xff]  ;;  %v150_v16 = vld [vmem:[#allocation2 + $0x380] sm:$0xff]  ;;  %v181_v19 = vld [vmem:[#allocation2 + $0x478] sm:$0xff]  ;;  %v239_v20 = vcombine.high %v1017_v17, %v1017_v17 }
  0x3a   :  { %796 = vmatpush3.msra.mxu0 %v113_v28  ;;  %829 = vmatpush3.msra.mxu1 %v146_v29  ;;  %v134_v18 = vld [vmem:[#allocation2 + $0x300] sm:$0xff]  ;;  %v180_v22 = vld [vmem:[#allocation2 + $0x470] sm:$0xff]  ;;  %v179_v23 = vld [vmem:[#allocation2 + $0x468] sm:$0xff] }
  0x3b   :  { %797 = vmatprep.subr.mxu0 %v128_v30  ;;  %830 = vmatprep.subr.mxu1 %v161_v31  ;;  %v178_v24 = vld [vmem:[#allocation2 + $0x460] sm:$0xff]  ;;  %v177_v25 = vld [vmem:[#allocation2 + $0x458] sm:$0xff]  ;;  %v176_v26 = vld [vmem:[#allocation2 + $0x450] sm:$0xff] }
  0x3c   :  { %798 = vmatpush3.msra.mxu0 %v112_v32  ;;  %831 = vmatpush3.msra.mxu1 %v145_v33  ;;  %v175_v27 = vld [vmem:[#allocation2 + $0x448] sm:$0xff]  ;;  %v174_v28 = vld [vmem:[#allocation2 + $0x440] sm:$0xff]  ;;  %v173_v29 = vld [vmem:[#allocation2 + $0x438] sm:$0xff] }
  0x3d   :  { %799 = vmatprep.subr.mxu0 %v127_v34  ;;  %832 = vmatprep.subr.mxu1 %v160_v35  ;;  %v172_v30 = vld [vmem:[#allocation2 + $0x430] sm:$0xff]  ;;  %v171_v31 = vld [vmem:[#allocation2 + $0x428] sm:$0xff]  ;;  %v170_v32 = vld [vmem:[#allocation2 + $0x420] sm:$0xff] }
  0x3e   :  { %800 = vmatpush3.msra.mxu0 %v111_v36  ;;  %833 = vmatpush3.msra.mxu1 %v144_v37  ;;  %v169_v33 = vld [vmem:[#allocation2 + $0x418] sm:$0xff]  ;;  %v168_v34 = vld [vmem:[#allocation2 + $0x410] sm:$0xff]  ;;  %v167_v35 = vld [vmem:[#allocation2 + $0x408] sm:$0xff] }
  0x3f   :  { %801 = vmatprep.subr.mxu0 %v126_v38  ;;  %834 = vmatprep.subr.mxu1 %v159_v39  ;;  %v166_v36 = vld [vmem:[#allocation2 + $0x400] sm:$0xff]  ;;  %v187_v37 = vld [vmem:[#allocation2 + $0x4a8] sm:$0xff]  ;;  %v185_v39 = vld [vmem:[#allocation2 + $0x498] sm:$0xff] }
  0x40   :  { %802 = vmatpush3.msra.mxu0 %v110_v40  ;;  %835 = vmatpush3.msra.mxu1 %v143_v41  ;;  %v186_v38 = vld [vmem:[#allocation2 + $0x4a0] sm:$0xff]  ;;  %v184_v40 = vld [vmem:[#allocation2 + $0x490] sm:$0xff]  ;;  %v183_v41 = vld [vmem:[#allocation2 + $0x488] sm:$0xff] }
  0x41   :  { %803 = vmatprep.subr.mxu0 %v125_v42  ;;  %836 = vmatprep.subr.mxu1 %v158_v43  ;;  %v182_v42 = vld [vmem:[#allocation2 + $0x480] sm:$0xff]  ;;  %v618_v43 = vld [vmem:[%s1121_s3 + $0x78] sm:$0xff]  ;;  %v604_v58 = vld [vmem:[%s1121_s3 + $0x8] sm:$0xff] }
  0x42   :  { %804 = vmatpush3.msra.mxu0 %v109_v44  ;;  %837 = vmatpush3.msra.mxu1 %v142_v45  ;;  %v617_v44 = vld [vmem:[%s1121_s3 + $0x70] sm:$0xff]  ;;  %v616_v45 = vld [vmem:[%s1121_s3 + $0x68] sm:$0xff]  ;;  %v713_v1 = vld [vmem:[%s1120_s2] ss:$0 sm:$0xff]  ;;  %s968_s2 = smov [#allocation5]  }
  0x43   :  { %805 = vmatprep.subr.mxu0 %v124_v46  ;;  %838 = vmatprep.subr.mxu1 %v157_v47  ;;  %v615_v46 = vld [vmem:[%s1121_s3 + $0x60] sm:$0xff]  ;;  %v614_v47 = vld [vmem:[%s1121_s3 + $0x58] sm:$0xff]  ;;  %s704_s12 = sshll.u32 %s968_s2, 4  ;;  %s705_s12 = int_to_ptr.vmem [resolvable:$true] %s704_s12 }
  0x44   :  { %806 = vmatpush3.msra.mxu0 %v108_v49  ;;  %839 = vmatpush3.msra.mxu1 %v141_v50  ;;  %v613_v49 = vld [vmem:[%s1121_s3 + $0x50] sm:$0xff]  ;;  %v612_v50 = vld [vmem:[%s1121_s3 + $0x48] sm:$0xff]  ;;  %s938_s13 = scalar_lea.vmem %s705_s12, 32  ;;  %p943_p6 = scmp.lt.s32.totalorder %s705_s12, %s705_s12 }
  0x45   :  { %807 = vmatprep.subr.mxu0 %v123_v51  ;;  %840 = vmatprep.subr.mxu1 %v156_v52  ;;  %v611_v51 = vld [vmem:[%s1121_s3 + $0x40] sm:$0xff]  ;;  %v610_v52 = vld [vmem:[%s1121_s3 + $0x38] sm:$0xff]  ;;  %p939_p5 = scmp.ne.s32.totalorder %s705_s12, %s938_s13  ;;  %p944_p7 = scmp.lt.s32.totalorder %s938_s13, %s938_s13 }
  0x46   :  { %808 = vmatpush3.msra.mxu0 %v107_v53  ;;  %841 = vmatpush3.msra.mxu1 %v140_v54  ;;  %v609_v53 = vld [vmem:[%s1121_s3 + $0x30] sm:$0xff]  ;;  %v608_v54 = vld [vmem:[%s1121_s3 + $0x28] sm:$0xff] }
  0x47   :  { %809 = vmatprep.subr.mxu0 %v122_v55  ;;  %842 = vmatprep.subr.mxu1 %v155_v56  ;;  %v607_v55 = vld [vmem:[%s1121_s3 + $0x20] sm:$0xff]  ;;  %v606_v56 = vld [vmem:[%s1121_s3 + $0x18] sm:$0xff]  ;;  %p945_p8 = por %p944_p7, %p943_p6 }
  0x48   :  { %810 = vmatpush3.msra.mxu0 %v106_v57  ;;  %843 = vmatpush3.msra.mxu1 %v139_v59  ;;  %v605_v57 = vld [vmem:[%s1121_s3 + $0x10] sm:$0xff]  ;;  %v603_v59 = vld [vmem:[%s1121_s3] sm:$0xff] }
  0x49   :  { %811 = vmatprep.subr.mxu0 %v121_v60  ;;  %844 = vmatprep.subr.mxu1 %v154_v61  ;;  %p946_p9 = pnand %p945_p8, %p939_p5 }
  0x4a   :  { %812 = vmatpush3.msra.mxu0 %v105_v62  ;;  %845 = vmatpush3.msra.mxu1 %v138_v63 }
  0x4b   :  { %813 = vmatprep.subr.mxu0 %v120_v0  ;;  %846 = vmatprep.subr.mxu1 %v153_v2 }
  0x4c   :  { %814 = vmatpush3.msra.mxu0 %v104_v3  ;;  %847 = vmatpush3.msra.mxu1 %v137_v5 }
  0x4d   :  { %815 = vmatprep.subr.mxu0 %v119_v6  ;;  %848 = vmatprep.subr.mxu1 %v152_v7 }
  0x4e   :  { %816 = vmatpush3.msra.mxu0 %v103_v8  ;;  %849 = vmatpush3.msra.mxu1 %v136_v9 }
  0x4f   :  { %817 = vmatprep.subr.mxu0 %v118_v10  ;;  %850 = vmatprep.subr.mxu1 %v151_v12 }
  0x50   :  { %818 = vmatpush3.msra.mxu0 %v102_v13  ;;  %456 = vmatprep.mubr.f32.mxu0 %v230_v14 }
  0x51   :  { %851 = vmatpush3.msra.mxu1 %v135_v15  ;;  %457 = vmatmul.mubr.f32.vlgmr.msra.gmra.mxu0 %v222_v4 }
  0x52   :  { %852 = vmatprep.subr.mxu1 %v150_v16  ;;  %532 = vmatprep.subr.mxu0 %v966_v21 }
  0x53   :  { %853 = vmatpush3.msra.mxu1 %v134_v18  ;;  %526 = vmatprep.mubr.f32.mxu1 %v231_v48 }
  0x54   :  { %533 = vmatpush1.msra.mxu0 %v181_v19  ;;  %527 = vmatmul.mubr.f32.vlgmr.msra.gmra.mxu1 %v229_v11 }
  0x55   :  { %534 = vmatprep.subr.mxu0 %v966_v21  ;;  %715 = vmatprep.mubr.msk.f32.mxu0 %vm249_vm0, %v239_v20 }
  0x56   :  { %535 = vmatpush1.msra.mxu0 %v180_v22  ;;  %874 = vmatprep.subr.mxu1 %v966_v21 }
  0x57   :  { %536 = vmatprep.subr.mxu0 %v966_v21  ;;  %875 = vmatpush3.msra.mxu1 %v618_v43 }
  0x58   :  { %537 = vmatpush1.msra.mxu0 %v179_v23  ;;  %876 = vmatprep.subr.mxu1 %v966_v21 }
  0x59   :  { %538 = vmatprep.subr.mxu0 %v966_v21  ;;  %877 = vmatpush3.msra.mxu1 %v617_v44 }
  0x5a   :  { %539 = vmatpush1.msra.mxu0 %v178_v24  ;;  %878 = vmatprep.subr.mxu1 %v966_v21 }
  0x5b   :  { %540 = vmatprep.subr.mxu0 %v966_v21  ;;  %879 = vmatpush3.msra.mxu1 %v616_v45 }
  0x5c   :  { %541 = vmatpush1.msra.mxu0 %v177_v25  ;;  %880 = vmatprep.subr.mxu1 %v966_v21 }
  0x5d   :  { %542 = vmatprep.subr.mxu0 %v966_v21  ;;  %881 = vmatpush3.msra.mxu1 %v615_v46 }
  0x5e   :  { %543 = vmatpush1.msra.mxu0 %v176_v26  ;;  %882 = vmatprep.subr.mxu1 %v966_v21 }
  0x5f   :  { %544 = vmatprep.subr.mxu0 %v966_v21  ;;  %883 = vmatpush3.msra.mxu1 %v614_v47 }
  0x60   :  { %545 = vmatpush1.msra.mxu0 %v175_v27  ;;  %884 = vmatprep.subr.mxu1 %v966_v21 }
  0x61   :  { %546 = vmatprep.subr.mxu0 %v966_v21  ;;  %885 = vmatpush3.msra.mxu1 %v613_v49 }
  0x62   :  { %547 = vmatpush1.msra.mxu0 %v174_v28  ;;  %886 = vmatprep.subr.mxu1 %v966_v21 }
  0x63   :  { %548 = vmatprep.subr.mxu0 %v966_v21  ;;  %887 = vmatpush3.msra.mxu1 %v612_v50 }
  0x64   :  { %549 = vmatpush1.msra.mxu0 %v173_v29  ;;  %888 = vmatprep.subr.mxu1 %v966_v21 }
  0x65   :  { %550 = vmatprep.subr.mxu0 %v966_v21  ;;  %889 = vmatpush3.msra.mxu1 %v611_v51 }
  0x66   :  { %551 = vmatpush1.msra.mxu0 %v172_v30  ;;  %890 = vmatprep.subr.mxu1 %v966_v21 }
  0x67   :  { %552 = vmatprep.subr.mxu0 %v966_v21  ;;  %891 = vmatpush3.msra.mxu1 %v610_v52 }
  0x68   :  { %553 = vmatpush1.msra.mxu0 %v171_v31  ;;  %892 = vmatprep.subr.mxu1 %v966_v21 }
  0x69   :  { %554 = vmatprep.subr.mxu0 %v966_v21  ;;  %893 = vmatpush3.msra.mxu1 %v609_v53 }
  0x6a   :  { %555 = vmatpush1.msra.mxu0 %v170_v32  ;;  %894 = vmatprep.subr.mxu1 %v966_v21 }
  0x6b   :  { %556 = vmatprep.subr.mxu0 %v966_v21  ;;  %895 = vmatpush3.msra.mxu1 %v608_v54 }
  0x6c   :  { %557 = vmatpush1.msra.mxu0 %v169_v33  ;;  %896 = vmatprep.subr.mxu1 %v966_v21 }
  0x6d   :  { %558 = vmatprep.subr.mxu0 %v966_v21  ;;  %897 = vmatpush3.msra.mxu1 %v607_v55 }
  0x6e   :  { %559 = vmatpush1.msra.mxu0 %v168_v34  ;;  %898 = vmatprep.subr.mxu1 %v966_v21 }
  0x6f   :  { %560 = vmatprep.subr.mxu0 %v966_v21  ;;  %899 = vmatpush3.msra.mxu1 %v606_v56 }
  0x70   :  { %561 = vmatpush1.msra.mxu0 %v167_v35  ;;  %900 = vmatprep.subr.mxu1 %v966_v21 }
  0x71   :  { %562 = vmatprep.subr.mxu0 %v966_v21  ;;  %901 = vmatpush3.msra.mxu1 %v605_v57 }
  0x72   :  { %563 = vmatpush1.msra.mxu0 %v166_v36  ;;  %902 = vmatprep.subr.mxu1 %v966_v21 }
  0x73   :  { %584 = vmatprep.subr.mxu0 %v966_v21  ;;  %903 = vmatpush3.msra.mxu1 %v604_v58 }
  0x74   :  { %585 = vmatpush2.msra.mxu0 %v187_v37  ;;  %904 = vmatprep.subr.mxu1 %v966_v21 }
  0x75   :  { %586 = vmatprep.subr.mxu0 %v966_v21  ;;  %905 = vmatpush3.msra.mxu1 %v603_v59 }
  0x76   :  { %587 = vmatpush2.msra.mxu0 %v186_v38  ;;  %906 = vmatprep.mubr.msk.f32.mxu1 %vm967_vm1, %v966_v21 }
  0x77   :  { %588 = vmatprep.subr.mxu0 %v966_v21 }
  0x78   :  { %589 = vmatpush2.msra.mxu0 %v185_v39 }
  0x79   :  { %590 = vmatprep.subr.mxu0 %v966_v21 }
  0x7a   :  { %591 = vmatpush2.msra.mxu0 %v184_v40 }
  0x7b   :  { %592 = vmatprep.subr.mxu0 %v966_v21 }
  0x7c   :  { %593 = vmatpush2.msra.mxu0 %v183_v41 }
  0x7d   :  { %594 = vmatprep.subr.mxu0 %v966_v21 }
  0x7e   :  { %595 = vmatpush2.msra.mxu0 %v182_v42 }
  0x7f   :  { %597 = vmatmul.mubr.f32.vlgmr.msra.gmra.mxu0 %v1017_v17  ;;  %v716_v17 = vld [vmem:[%s1122_s4] ss:$0 sm:$0xff] }
  0xef   :  { %v749_v60 = vpop.f32.mrf.mxu0 }
  0xf1   :  { %v750_v61 = vpop.f32.mrf.mxu0 }
  0xf2   :  { %v784_v62 = vpop.f32.mrf.mxu1  ;;  %v751_v0 = vadd.f32 %v750_v61, %v749_v60 }
  0xf4   :  { %v785_v2 = vpop.f32.mrf.mxu1  ;;  %v319_v5 = vadd.f32 %v751_v0, %v713_v1 }
  0xf5   :  { %v786_v6 = vadd.f32 %v785_v2, %v784_v62 }
  0xf7   :  { %v389_v9 = vadd.f32 %v786_v6, %v319_v5 }
 0x111   :  { %v819_v63 = vpop.f32.mrf.mxu0 }
 0x113   :  { %v820_v3 = vpop.f32.mrf.mxu0 }
 0x114   :  { %v854_v4 = vpop.f32.mrf.mxu1  ;;  %v821_v7 = vadd.f32 %v820_v3, %v819_v63 }
 0x116   :  { %v855_v8 = vpop.f32.mrf.mxu1  ;;  %v459_v10 = vadd.f32 %v821_v7, %v389_v9 }
 0x117   :  { %v856_v11 = vadd.f32 %v855_v8, %v854_v4 }
 0x119   :  { %v529_v12 = vadd.f32 %v856_v11, %v459_v10 }
 0x13f   :  { %v598_v13 = vpop.f32.mrf.mxu0 }
 0x140   :  { %v599_v14 = vadd.f32 %v598_v13, %v529_v12 }
 0x141   :  { %v600_v15 = vpop.f32.mrf.mxu0 }
 0x142   :  { %v602_v16 = vmax.f32 %v599_v14, 0.0 }
 0x144   :  { %907 = vmatmul.mubr.f32.vlgmr.msra.gmra.mxu1 %v602_v16 }
 0x204   :  { %v692_v18 = vpop.f32.mrf.mxu1 }
 0x205   :  { %v693_v48 = vadd.f32 %v716_v17, %v692_v18 }
 0x206   :  { %v908_v19 = vpop.f32.mrf.mxu1 }
 0x207   :  { %697 = vst.msk [vmem:[#allocation5] sm:$0x3] %vm696_vm2, %v693_v48 }
 0x208   :  { %949 = shalt.err (!%p946_p9)
}
 0x209   :  { %707 = dma.vmem_to_hbm [thread:$0]  %s705_s12, 32, %s1123_s5, [#allocation4]  }
 0x20a   :  { %960 = dma.done.wait [#allocation4], 32  }
 0x20b   :  { %961 = vsyncadd [#allocation4], 4294967264 }
 0x20c   :  { %711 = vsyncpa [#allocation3], 1 }
 0x20d   :  { %712 = vsyncpa [#allocation4], 1 }

</bundles_post_ra>
